<compile_context>
chip_gen: v6e
topology: v6e:2x2x1
jax: 0.10.0
libtpu: 0.0.40
codegen_flags: <defaults>
</compile_context>

<pallas_src>
import functools

import jax
import jax.numpy as jnp
from jax import lax
from jax.experimental import pallas as pl
from jax.experimental.pallas import tpu as pltpu

LOG2E = 1.4426950408889634


# ------------------------------ helpers -------------------------------------

def _pick_tile(n, candidates):
    for c in candidates:
        if n >= c and n % c == 0:
            return c
    return n


def _device_kind():
    try:
        return jax.devices()[0].device_kind.lower()
    except Exception:
        return ""


def _vmem_limit_bytes(kind):
    # v7x has 64 MiB physical VMEM per TensorCore; v5e/v6e have 128 MiB.
    if "v7" in kind:
        return 48 * 1024 * 1024
    return 96 * 1024 * 1024


def rotary_freqs(n, dim_head):
    inv_freq = 1.0 / (10000.0 ** (jnp.arange(0, dim_head, 2, dtype=jnp.float32)
                                  / dim_head))
    t = jnp.arange(n, dtype=jnp.float32)
    freqs = jnp.einsum('i,j->ij', t, inv_freq)          # (n, dim_head/2)
    return jnp.concatenate([freqs, freqs], axis=-1)     # (n, dim_head)


def _rotate_half_matrix(dim_head):
    # R such that (q @ R) == rotate_half(q) == concat(-q[:, half:], q[:, :half]).
    half = dim_head // 2
    r = jnp.zeros((dim_head, dim_head), jnp.float32)
    r = r.at[half:, :half].set(-jnp.eye(half, dtype=jnp.float32))
    r = r.at[:half, half:].set(jnp.eye(half, dtype=jnp.float32))
    return r


# ----------------------- kernel 1: fused q/kv projection (+ rope) ------------

def _qkv_rope_kernel(x_ref, w_ref, cos_ref, sin_ref, q_out_ref, kv_out_ref, *,
                     heads, dim_head, dim):
    # x: (tp, dim); w: (dim, 4*dim) = [Wq' | Wkv | Wq'@R | Wkv@R]  (R = rotate_half, per head)
    # q_out / kv_out: (heads, tp, dim_head)   (batch dim squeezed)
    y = jnp.dot(x_ref[...], w_ref[...], preferred_element_type=jnp.float32)
    cos = cos_ref[...]                                     # (tp, dim), tiled per head
    sin = sin_ref[...]
    q = y[:, :dim] * cos + y[:, 2 * dim:3 * dim] * sin     # lane-dense rope, no per-head slicing
    kv = y[:, dim:2 * dim] * cos + y[:, 3 * dim:] * sin
    for h in range(heads):                                 # heads is small & static
        lo = h * dim_head
        q_out_ref[h] = q[:, lo:lo + dim_head].astype(q_out_ref.dtype)
        kv_out_ref[h] = kv[:, lo:lo + dim_head].astype(kv_out_ref.dtype)


def _qkv_kernel(x_ref, w_ref, q_out_ref, kv_out_ref, *, heads, dim_head, dim):
    # layer_num != 0: no rope, no cos/sin inputs; w: (dim, 2*dim) = [Wq' | Wkv]
    y = jnp.dot(x_ref[...], w_ref[...], preferred_element_type=jnp.float32)
    for h in range(heads):
        lo = h * dim_head
        q_out_ref[h] = y[:, lo:lo + dim_head].astype(q_out_ref.dtype)
        kv_out_ref[h] = y[:, dim + lo:dim + lo + dim_head].astype(kv_out_ref.dtype)


# ---------- kernel 2: q-tiled flash attention + fused output projection ------

def _attn_out_kernel(q_ref, kv_ref, wo_ref, bo_ref, o_ref,
                     m_sc, l_sc, acc_sc, out_acc):
    # q_ref: (tq, d)  (already scaled by scale*log2e), kv_ref: (tk, d),
    # wo_ref: (d, dim) slice of W_out for this head, o_ref: (tq, dim).
    # out_acc is resident across heads & kv tiles for one (batch, q-tile).
    hi = pl.program_id(2)
    ki = pl.program_id(3)
    nh = pl.num_programs(2)
    nk = pl.num_programs(3)

    @pl.when(jnp.logical_and(hi == 0, ki == 0))
    def _():
        out_acc[...] = jnp.zeros(out_acc.shape, out_acc.dtype)

    @pl.when(ki == 0)
    def _():
        m_sc[...] = jnp.full(m_sc.shape, -jnp.inf, jnp.float32)
        l_sc[...] = jnp.zeros(l_sc.shape, jnp.float32)
        acc_sc[...] = jnp.zeros(acc_sc.shape, jnp.float32)

    q = q_ref[...]
    k = kv_ref[...]
    # scores (log2 domain): (tq, tk) = q @ k^T  (contraction on d, no materialized transpose)
    s = lax.dot_general(q, k, (((1,), (1,)), ((), ())),
                        preferred_element_type=jnp.float32)

    m_prev = m_sc[...]                                          # (tq, 128), all lanes equal
    m_new = jnp.maximum(m_prev, jnp.max(s, axis=-1, keepdims=True))
    alpha = jnp.exp2(m_prev - m_new)                            # (tq, 128)
    p = jnp.exp2(s - m_new[:, :1])                              # (tq, tk)
    l_sc[...] = alpha * l_sc[...] + jnp.sum(p, axis=-1, keepdims=True)
    acc_sc[...] = alpha[:, :1] * acc_sc[...] + jnp.dot(
        p.astype(k.dtype), k, preferred_element_type=jnp.float32)
    m_sc[...] = m_new

    @pl.when(ki == nk - 1)
    def _():
        # Finalize this head's softmax and fold it straight into the output projection.
        inv_l = pl.reciprocal(l_sc[...][:, :1], approx=True)    # (tq, 1)
        out_h = acc_sc[...] * inv_l                             # (tq, d)
        out_acc[...] += jnp.dot(out_h.astype(wo_ref.dtype), wo_ref[...],
                                preferred_element_type=jnp.float32)

    @pl.when(jnp.logical_and(hi == nh - 1, ki == nk - 1))
    def _():
        o_ref[...] = (out_acc[...] + bo_ref[...]).astype(o_ref.dtype)


# ------------------------------ full forward ---------------------------------

def mh_attention_forward(x, params, *, heads, layer_num=0):
    b, n, dim = x.shape
    d = dim // heads
    scale = d ** (-0.5)
    dtype = x.dtype
    apply_rope = (layer_num == 0)

    kind = _device_kind()
    vmem = _vmem_limit_bytes(kind)
    is_v5e = ("v5e" in kind) or ("v5 lite" in kind) or ("v5lite" in kind)

    # Fold the softmax scale AND the exp2 base change (log2 e) into W_q; both are scalars and
    # rotary is linear, so this commutes with everything downstream.
    wq = params['w_q_t'] * (scale * LOG2E)
    wkv = params['w_kv_t']
    wo = params['w_out0_t'].astype(dtype)
    bo = params['b_out0'].reshape(1, dim).astype(jnp.float32)

    if apply_rope:
        freqs = rotary_freqs(n, d)                        # (n, d) f32, constant-folded under jit
        cos_full = jnp.tile(jnp.cos(freqs), (1, heads)).astype(jnp.float32)   # (n, dim)
        sin_full = jnp.tile(jnp.sin(freqs), (1, heads)).astype(jnp.float32)   # (n, dim)
        r_full = jnp.kron(jnp.eye(heads, dtype=jnp.float32), _rotate_half_matrix(d))
        # One fused projection weight: [Wq' | Wkv | Wq'@R | Wkv@R]  -> single MXU pass.
        w_big = jnp.concatenate([wq, wkv, wq @ r_full, wkv @ r_full], axis=1).astype(dtype)
    else:
        w_big = jnp.concatenate([wq, wkv], axis=1).astype(dtype)

    # ------------------------- kernel 1: projections -------------------------
    tp = _pick_tile(n, (512, 256, 128))
    cp1 = pltpu.CompilerParams(dimension_semantics=("parallel", "parallel"),
                               vmem_limit_bytes=vmem)

    if apply_rope:
        kernel1 = functools.partial(_qkv_rope_kernel, heads=heads, dim_head=d, dim=dim)
        in_specs1 = [
            pl.BlockSpec((None, tp, dim), lambda bi, ti: (bi, ti, 0)),
            pl.BlockSpec((dim, 4 * dim), lambda bi, ti: (0, 0)),
            pl.BlockSpec((tp, dim), lambda bi, ti: (ti, 0)),
            pl.BlockSpec((tp, dim), lambda bi, ti: (ti, 0)),
        ]
        args1 = (x, w_big, cos_full, sin_full)
    else:
        kernel1 = functools.partial(_qkv_kernel, heads=heads, dim_head=d, dim=dim)
        in_specs1 = [
            pl.BlockSpec((None, tp, dim), lambda bi, ti: (bi, ti, 0)),
            pl.BlockSpec((dim, 2 * dim), lambda bi, ti: (0, 0)),
        ]
        args1 = (x, w_big)

    q_heads, kv_heads = pl.pallas_call(
        kernel1,
        grid=(b, n // tp),
        in_specs=in_specs1,
        out_specs=[
            pl.BlockSpec((None, heads, tp, d), lambda bi, ti: (bi, 0, ti, 0)),
            pl.BlockSpec((None, heads, tp, d), lambda bi, ti: (bi, 0, ti, 0)),
        ],
        out_shape=[
            jax.ShapeDtypeStruct((b, heads, n, d), dtype),
            jax.ShapeDtypeStruct((b, heads, n, d), dtype),
        ],
        compiler_params=cp1,
    )(*args1)

    # --------------------- kernel 2: attention + out proj --------------------
    tq = _pick_tile(n, (256, 128))
    tk = _pick_tile(n, (256, 128) if is_v5e else (512, 256, 128))

    cp2 = pltpu.CompilerParams(
        dimension_semantics=("parallel", "parallel", "arbitrary", "arbitrary"),
        vmem_limit_bytes=vmem)

    out = pl.pallas_call(
        _attn_out_kernel,
        grid=(b, n // tq, heads, n // tk),
        in_specs=[
            pl.BlockSpec((None, None, tq, d), lambda bi, qi, hi, ki: (bi, hi, qi, 0)),
            pl.BlockSpec((None, None, tk, d), lambda bi, qi, hi, ki: (bi, hi, ki, 0)),
            pl.BlockSpec((d, dim), lambda bi, qi, hi, ki: (hi, 0)),
            pl.BlockSpec((1, dim), lambda bi, qi, hi, ki: (0, 0)),
        ],
        out_specs=pl.BlockSpec((None, tq, dim), lambda bi, qi, hi, ki: (bi, qi, 0)),
        out_shape=jax.ShapeDtypeStruct((b, n, dim), dtype),
        scratch_shapes=[
            pltpu.VMEM((tq, 128), jnp.float32),   # running max (128-lane wide, unmasked vld/vst)
            pltpu.VMEM((tq, 128), jnp.float32),   # running denominator
            pltpu.VMEM((tq, d), jnp.float32),     # per-head attention accumulator
            pltpu.VMEM((tq, dim), jnp.float32),   # fused output-projection accumulator
        ],
        compiler_params=cp2,
    )(q_heads, kv_heads, wo, bo)
    return out


# --------------------------- pure-JAX reference -------------------------------

def _rotate_half_ref(x):
    x1, x2 = jnp.split(x, 2, axis=-1)
    return jnp.concatenate([-x2, x1], axis=-1)


def _apply_rotary_ref(freqs, t):
    return t * jnp.cos(freqs) + _rotate_half_ref(t) * jnp.sin(freqs)


def mh_attention_reference(x, params, *, heads, layer_num=0):
    b, n, dim = x.shape
    d = dim // heads
    scale = d ** (-0.5)
    q = x @ params['w_q_t']
    kv = x @ params['w_kv_t']

    def split_heads(t):
        return t.reshape(b, n, heads, d).transpose(0, 2, 1, 3).reshape(b * heads, n, d)

    q, kv = split_heads(q), split_heads(kv)
    if layer_num == 0:
        freqs = rotary_freqs(n, d)[None]
        q = _apply_rotary_ref(freqs, q)
        kv = _apply_rotary_ref(freqs, kv)
    q = q * scale
    att = jnp.einsum('bmd,bnd->bmn', q, kv)
    att = jax.nn.softmax(att, axis=-1)
    out = jnp.einsum('bmn,bnd->bmd', att, kv)
    out = out.reshape(b, heads, n, d).transpose(0, 2, 1, 3).reshape(b, n, dim)
    return out @ params['w_out0_t'] + params['b_out0']


# ---------------------------------- main --------------------------------------

if __name__ == "__main__":
    # Small shapes consistent with the module: dim divisible by heads.
    b, n, dim, heads = 2, 8, 32, 4

    key = jax.random.PRNGKey(0)
    k_x, k_q, k_kv, k_o, k_b = jax.random.split(key, 5)

    x = jax.random.normal(k_x, (b, n, dim), dtype=jnp.float32)

    # PyTorch Linear computes x @ W^T + b; we store W^T directly: shape (in, out).
    params = {
        'w_q_t':    jax.random.normal(k_q,  (dim, dim), dtype=jnp.float32) * 0.05,
        'w_kv_t':   jax.random.normal(k_kv, (dim, dim), dtype=jnp.float32) * 0.05,
        'w_out0_t': jax.random.normal(k_o,  (dim, dim), dtype=jnp.float32) * 0.05,
        'b_out0':   jax.random.normal(k_b,  (1, dim),   dtype=jnp.float32) * 0.05,
    }

    fwd = jax.jit(functools.partial(mh_attention_forward, heads=heads, layer_num=0))
    out = fwd(x, params)
    out = jax.block_until_ready(out)

    ref = mh_attention_reference(x, params, heads=heads, layer_num=0)
    assert out.shape == (b, n, dim), out.shape
    # approx reciprocal (EUP) in the softmax denominator -> ~1e-4 relative error budget
    assert jnp.allclose(out, ref, rtol=1e-3, atol=1e-3), \
        float(jnp.max(jnp.abs(out - ref)))

    print("KERNEL_OK")
</pallas_src>

<mosaic_0001>
module attributes {stable_mosaic.version = 11 : i64} {
  func.func @_qkv_rope_kernel(%arg0: i32, %arg1: i32, %arg2: memref<1x8x32xf32, #tpu.memory_space<vmem>>, %arg3: memref<32x128xf32, #tpu.memory_space<vmem>>, %arg4: memref<8x32xf32, #tpu.memory_space<vmem>>, %arg5: memref<8x32xf32, #tpu.memory_space<vmem>>, %arg6: memref<1x4x8x8xf32, #tpu.memory_space<vmem>>, %arg7: memref<1x4x8x8xf32, #tpu.memory_space<vmem>>) attributes {dimension_semantics = [#tpu.dimension_semantics<parallel>, #tpu.dimension_semantics<parallel>], iteration_bounds = array<i64: 2, 1>, scalar_prefetch = 0 : i64, scratch_operands = 0 : i64, tpu.core_type = #tpu.core_type<tc>, window_params = [{transform_indices = @transform_0, window_bounds = array<i64: 1, 8, 32>}, {pipeline_mode = #tpu.pipeline_mode<synchronous>, transform_indices = @transform_1, window_bounds = array<i64: 32, 128>}, {transform_indices = @transform_2, window_bounds = array<i64: 8, 32>}, {transform_indices = @transform_3, window_bounds = array<i64: 8, 32>}, {transform_indices = @transform_4, window_bounds = array<i64: 1, 4, 8, 8>}, {transform_indices = @transform_5, window_bounds = array<i64: 1, 4, 8, 8>}]} {
    %c0 = arith.constant 0 : index
    %c0_0 = arith.constant 0 : index
    %c0_1 = arith.constant 0 : index
    %0 = vector.load %arg2[%c0, %c0_0, %c0_1] : memref<1x8x32xf32, #tpu.memory_space<vmem>>, vector<1x8x32xf32>
    %1 = vector.shape_cast %0 : vector<1x8x32xf32> to vector<8x32xf32>
    %c0_2 = arith.constant 0 : index
    %c0_3 = arith.constant 0 : index
    %2 = vector.load %arg3[%c0_2, %c0_3] : memref<32x128xf32, #tpu.memory_space<vmem>>, vector<32x128xf32>
    %cst = arith.constant dense<0.000000e+00> : vector<8x128xf32>
    %3 = tpu.matmul %1, %2, %cst {dimension_numbers = #tpu.dot_dimension_numbers<[1], [0], [0], [1], [0, 0, 1, 1], [], []>} : vector<8x32xf32>, vector<32x128xf32>, vector<8x128xf32> -> vector<8x128xf32>
    %c0_4 = arith.constant 0 : index
    %c0_5 = arith.constant 0 : index
    %4 = vector.load %arg4[%c0_4, %c0_5] : memref<8x32xf32, #tpu.memory_space<vmem>>, vector<8x32xf32>
    %c0_6 = arith.constant 0 : index
    %c0_7 = arith.constant 0 : index
    %5 = vector.load %arg5[%c0_6, %c0_7] : memref<8x32xf32, #tpu.memory_space<vmem>>, vector<8x32xf32>
    %6 = vector.extract_strided_slice %3 {offsets = [0, 0], sizes = [8, 32], strides = [1, 1]} : vector<8x128xf32> to vector<8x32xf32>
    %7 = arith.mulf %6, %4 : vector<8x32xf32>
    %8 = vector.extract_strided_slice %3 {offsets = [0, 64], sizes = [8, 32], strides = [1, 1]} : vector<8x128xf32> to vector<8x32xf32>
    %9 = arith.mulf %8, %5 : vector<8x32xf32>
    %10 = arith.addf %7, %9 : vector<8x32xf32>
    %11 = vector.extract_strided_slice %3 {offsets = [0, 32], sizes = [8, 32], strides = [1, 1]} : vector<8x128xf32> to vector<8x32xf32>
    %12 = arith.mulf %11, %4 : vector<8x32xf32>
    %13 = vector.extract_strided_slice %3 {offsets = [0, 96], sizes = [8, 32], strides = [1, 1]} : vector<8x128xf32> to vector<8x32xf32>
    %14 = arith.mulf %13, %5 : vector<8x32xf32>
    %15 = arith.addf %12, %14 : vector<8x32xf32>
    %16 = vector.extract_strided_slice %10 {offsets = [0, 0], sizes = [8, 8], strides = [1, 1]} : vector<8x32xf32> to vector<8x8xf32>
    %c0_8 = arith.constant 0 : index
    %c0_9 = arith.constant 0 : index
    %c0_10 = arith.constant 0 : index
    %c0_11 = arith.constant 0 : index
    %17 = vector.load %arg6[%c0_8, %c0_9, %c0_10, %c0_11] : memref<1x4x8x8xf32, #tpu.memory_space<vmem>>, vector<1x1x8x8xf32>
    %18 = vector.shape_cast %17 : vector<1x1x8x8xf32> to vector<8x8xf32>
    %19 = vector.shape_cast %16 : vector<8x8xf32> to vector<1x1x8x8xf32>
    tpu.vector_store %arg6[%c0_8, %c0_9, %c0_10, %c0_11], %19 {strides = array<i32>} : memref<1x4x8x8xf32, #tpu.memory_space<vmem>>, vector<1x1x8x8xf32>,
    %20 = vector.extract_strided_slice %15 {offsets = [0, 0], sizes = [8, 8], strides = [1, 1]} : vector<8x32xf32> to vector<8x8xf32>
    %c0_12 = arith.constant 0 : index
    %c0_13 = arith.constant 0 : index
    %c0_14 = arith.constant 0 : index
    %c0_15 = arith.constant 0 : index
    %21 = vector.load %arg7[%c0_12, %c0_13, %c0_14, %c0_15] : memref<1x4x8x8xf32, #tpu.memory_space<vmem>>, vector<1x1x8x8xf32>
    %22 = vector.shape_cast %21 : vector<1x1x8x8xf32> to vector<8x8xf32>
    %23 = vector.shape_cast %20 : vector<8x8xf32> to vector<1x1x8x8xf32>
    tpu.vector_store %arg7[%c0_12, %c0_13, %c0_14, %c0_15], %23 {strides = array<i32>} : memref<1x4x8x8xf32, #tpu.memory_space<vmem>>, vector<1x1x8x8xf32>,
    %24 = vector.extract_strided_slice %10 {offsets = [0, 8], sizes = [8, 8], strides = [1, 1]} : vector<8x32xf32> to vector<8x8xf32>
    %c0_16 = arith.constant 0 : index
    %c1 = arith.constant 1 : index
    %c0_17 = arith.constant 0 : index
    %c0_18 = arith.constant 0 : index
    %25 = vector.load %arg6[%c0_16, %c1, %c0_17, %c0_18] : memref<1x4x8x8xf32, #tpu.memory_space<vmem>>, vector<1x1x8x8xf32>
    %26 = vector.shape_cast %25 : vector<1x1x8x8xf32> to vector<8x8xf32>
    %27 = vector.shape_cast %24 : vector<8x8xf32> to vector<1x1x8x8xf32>
    tpu.vector_store %arg6[%c0_16, %c1, %c0_17, %c0_18], %27 {strides = array<i32>} : memref<1x4x8x8xf32, #tpu.memory_space<vmem>>, vector<1x1x8x8xf32>,
    %28 = vector.extract_strided_slice %15 {offsets = [0, 8], sizes = [8, 8], strides = [1, 1]} : vector<8x32xf32> to vector<8x8xf32>
    %c0_19 = arith.constant 0 : index
    %c1_20 = arith.constant 1 : index
    %c0_21 = arith.constant 0 : index
    %c0_22 = arith.constant 0 : index
    %29 = vector.load %arg7[%c0_19, %c1_20, %c0_21, %c0_22] : memref<1x4x8x8xf32, #tpu.memory_space<vmem>>, vector<1x1x8x8xf32>
    %30 = vector.shape_cast %29 : vector<1x1x8x8xf32> to vector<8x8xf32>
    %31 = vector.shape_cast %28 : vector<8x8xf32> to vector<1x1x8x8xf32>
    tpu.vector_store %arg7[%c0_19, %c1_20, %c0_21, %c0_22], %31 {strides = array<i32>} : memref<1x4x8x8xf32, #tpu.memory_space<vmem>>, vector<1x1x8x8xf32>,
    %32 = vector.extract_strided_slice %10 {offsets = [0, 16], sizes = [8, 8], strides = [1, 1]} : vector<8x32xf32> to vector<8x8xf32>
    %c0_23 = arith.constant 0 : index
    %c2 = arith.constant 2 : index
    %c0_24 = arith.constant 0 : index
    %c0_25 = arith.constant 0 : index
    %33 = vector.load %arg6[%c0_23, %c2, %c0_24, %c0_25] : memref<1x4x8x8xf32, #tpu.memory_space<vmem>>, vector<1x1x8x8xf32>
    %34 = vector.shape_cast %33 : vector<1x1x8x8xf32> to vector<8x8xf32>
    %35 = vector.shape_cast %32 : vector<8x8xf32> to vector<1x1x8x8xf32>
    tpu.vector_store %arg6[%c0_23, %c2, %c0_24, %c0_25], %35 {strides = array<i32>} : memref<1x4x8x8xf32, #tpu.memory_space<vmem>>, vector<1x1x8x8xf32>,
    %36 = vector.extract_strided_slice %15 {offsets = [0, 16], sizes = [8, 8], strides = [1, 1]} : vector<8x32xf32> to vector<8x8xf32>
    %c0_26 = arith.constant 0 : index
    %c2_27 = arith.constant 2 : index
    %c0_28 = arith.constant 0 : index
    %c0_29 = arith.constant 0 : index
    %37 = vector.load %arg7[%c0_26, %c2_27, %c0_28, %c0_29] : memref<1x4x8x8xf32, #tpu.memory_space<vmem>>, vector<1x1x8x8xf32>
    %38 = vector.shape_cast %37 : vector<1x1x8x8xf32> to vector<8x8xf32>
    %39 = vector.shape_cast %36 : vector<8x8xf32> to vector<1x1x8x8xf32>
    tpu.vector_store %arg7[%c0_26, %c2_27, %c0_28, %c0_29], %39 {strides = array<i32>} : memref<1x4x8x8xf32, #tpu.memory_space<vmem>>, vector<1x1x8x8xf32>,
    %40 = vector.extract_strided_slice %10 {offsets = [0, 24], sizes = [8, 8], strides = [1, 1]} : vector<8x32xf32> to vector<8x8xf32>
    %c0_30 = arith.constant 0 : index
    %c3 = arith.constant 3 : index
    %c0_31 = arith.constant 0 : index
    %c0_32 = arith.constant 0 : index
    %41 = vector.load %arg6[%c0_30, %c3, %c0_31, %c0_32] : memref<1x4x8x8xf32, #tpu.memory_space<vmem>>, vector<1x1x8x8xf32>
    %42 = vector.shape_cast %41 : vector<1x1x8x8xf32> to vector<8x8xf32>
    %43 = vector.shape_cast %40 : vector<8x8xf32> to vector<1x1x8x8xf32>
    tpu.vector_store %arg6[%c0_30, %c3, %c0_31, %c0_32], %43 {strides = array<i32>} : memref<1x4x8x8xf32, #tpu.memory_space<vmem>>, vector<1x1x8x8xf32>,
    %44 = vector.extract_strided_slice %15 {offsets = [0, 24], sizes = [8, 8], strides = [1, 1]} : vector<8x32xf32> to vector<8x8xf32>
    %c0_33 = arith.constant 0 : index
    %c3_34 = arith.constant 3 : index
    %c0_35 = arith.constant 0 : index
    %c0_36 = arith.constant 0 : index
    %45 = vector.load %arg7[%c0_33, %c3_34, %c0_35, %c0_36] : memref<1x4x8x8xf32, #tpu.memory_space<vmem>>, vector<1x1x8x8xf32>
    %46 = vector.shape_cast %45 : vector<1x1x8x8xf32> to vector<8x8xf32>
    %47 = vector.shape_cast %44 : vector<8x8xf32> to vector<1x1x8x8xf32>
    tpu.vector_store %arg7[%c0_33, %c3_34, %c0_35, %c0_36], %47 {strides = array<i32>} : memref<1x4x8x8xf32, #tpu.memory_space<vmem>>, vector<1x1x8x8xf32>,
    return
  }
  func.func @transform_0(%arg0: i32, %arg1: i32) -> (i32, i32, i32) {
    %c0_i32 = arith.constant 0 : i32
    %c0_i32_0 = arith.constant 0 : i32
    return %arg0, %arg1, %c0_i32 : i32, i32, i32
  }
  func.func @transform_1(%arg0: i32, %arg1: i32) -> (i32, i32) {
    %c0_i32 = arith.constant 0 : i32
    %c0_i32_0 = arith.constant 0 : i32
    %c0_i32_1 = arith.constant 0 : i32
    return %c0_i32, %c0_i32_0 : i32, i32
  }
  func.func @transform_2(%arg0: i32, %arg1: i32) -> (i32, i32) {
    %c0_i32 = arith.constant 0 : i32
    %c0_i32_0 = arith.constant 0 : i32
    return %arg1, %c0_i32 : i32, i32
  }
  func.func @transform_3(%arg0: i32, %arg1: i32) -> (i32, i32) {
    %c0_i32 = arith.constant 0 : i32
    %c0_i32_0 = arith.constant 0 : i32
    return %arg1, %c0_i32 : i32, i32
  }
  func.func @transform_4(%arg0: i32, %arg1: i32) -> (i32, i32, i32, i32) {
    %c0_i32 = arith.constant 0 : i32
    %c0_i32_0 = arith.constant 0 : i32
    %c0_i32_1 = arith.constant 0 : i32
    return %arg0, %c0_i32, %arg1, %c0_i32_0 : i32, i32, i32, i32
  }
  func.func @transform_5(%arg0: i32, %arg1: i32) -> (i32, i32, i32, i32) {
    %c0_i32 = arith.constant 0 : i32
    %c0_i32_0 = arith.constant 0 : i32
    %c0_i32_1 = arith.constant 0 : i32
    return %arg0, %c0_i32, %arg1, %c0_i32_0 : i32, i32, i32, i32
  }
}

module attributes {stable_mosaic.version = 11 : i64} {
  func.func @_attn_out_kernel(%arg0: i32, %arg1: i32, %arg2: i32, %arg3: i32, %arg4: memref<1x1x8x8xf32, #tpu.memory_space<vmem>>, %arg5: memref<1x1x8x8xf32, #tpu.memory_space<vmem>>, %arg6: memref<8x32xf32, #tpu.memory_space<vmem>>, %arg7: memref<1x32xf32, #tpu.memory_space<vmem>>, %arg8: memref<1x8x32xf32, #tpu.memory_space<vmem>>, %arg9: memref<8x128xf32, #tpu.memory_space<vmem>>, %arg10: memref<8x128xf32, #tpu.memory_space<vmem>>, %arg11: memref<8x8xf32, #tpu.memory_space<vmem>>, %arg12: memref<8x32xf32, #tpu.memory_space<vmem>>) attributes {dimension_semantics = [#tpu.dimension_semantics<parallel>, #tpu.dimension_semantics<parallel>, #tpu.dimension_semantics<arbitrary>, #tpu.dimension_semantics<arbitrary>], iteration_bounds = array<i64: 2, 1, 4, 1>, scalar_prefetch = 0 : i64, scratch_operands = 4 : i64, tpu.core_type = #tpu.core_type<tc>, window_params = [{transform_indices = @transform_0, window_bounds = array<i64: 1, 1, 8, 8>}, {transform_indices = @transform_1, window_bounds = array<i64: 1, 1, 8, 8>}, {transform_indices = @transform_2, window_bounds = array<i64: 8, 32>}, {pipeline_mode = #tpu.pipeline_mode<synchronous>, transform_indices = @transform_3, window_bounds = array<i64: 1, 32>}, {transform_indices = @transform_4, window_bounds = array<i64: 1, 8, 32>}]} {
    %c0_i32 = arith.constant 0 : i32
    %0 = arith.cmpi eq, %arg2, %c0_i32 : i32
    %c0_i32_0 = arith.constant 0 : i32
    %1 = arith.cmpi eq, %arg3, %c0_i32_0 : i32
    %2 = arith.andi %0, %1 : i1
    %3 = arith.extui %2 : i1 to i32
    %c0_i32_1 = arith.constant 0 : i32
    %4 = arith.cmpi ne, %3, %c0_i32_1 : i32
    scf.if %4 {
      %cst_30 = arith.constant 0.000000e+00 : f32
      %47 = vector.broadcast %cst_30 : f32 to vector<8x32xf32>
      %c0_31 = arith.constant 0 : index
      %c0_32 = arith.constant 0 : index
      %48 = vector.load %arg12[%c0_31, %c0_32] : memref<8x32xf32, #tpu.memory_space<vmem>>, vector<8x32xf32>
      tpu.vector_store %arg12[%c0_31, %c0_32], %47 {strides = array<i32>} : memref<8x32xf32, #tpu.memory_space<vmem>>, vector<8x32xf32>,
    } else {
    }
    %c0_i32_2 = arith.constant 0 : i32
    %5 = arith.cmpi eq, %arg3, %c0_i32_2 : i32
    %6 = arith.extui %5 : i1 to i32
    %c0_i32_3 = arith.constant 0 : i32
    %7 = arith.cmpi ne, %6, %c0_i32_3 : i32
    scf.if %7 {
      %cst_30 = arith.constant 0xFF800000 : f32
      %47 = vector.broadcast %cst_30 : f32 to vector<8x128xf32>
      %c0_31 = arith.constant 0 : index
      %c0_32 = arith.constant 0 : index
      %48 = vector.load %arg9[%c0_31, %c0_32] : memref<8x128xf32, #tpu.memory_space<vmem>>, vector<8x128xf32>
      tpu.vector_store %arg9[%c0_31, %c0_32], %47 {strides = array<i32>} : memref<8x128xf32, #tpu.memory_space<vmem>>, vector<8x128xf32>,
      %cst_33 = arith.constant 0.000000e+00 : f32
      %49 = vector.broadcast %cst_33 : f32 to vector<8x128xf32>
      %c0_34 = arith.constant 0 : index
      %c0_35 = arith.constant 0 : index
      %50 = vector.load %arg10[%c0_34, %c0_35] : memref<8x128xf32, #tpu.memory_space<vmem>>, vector<8x128xf32>
      tpu.vector_store %arg10[%c0_34, %c0_35], %49 {strides = array<i32>} : memref<8x128xf32, #tpu.memory_space<vmem>>, vector<8x128xf32>,
      %cst_36 = arith.constant 0.000000e+00 : f32
      %51 = vector.broadcast %cst_36 : f32 to vector<8x8xf32>
      %c0_37 = arith.constant 0 : index
      %c0_38 = arith.constant 0 : index
      %52 = vector.load %arg11[%c0_37, %c0_38] : memref<8x8xf32, #tpu.memory_space<vmem>>, vector<8x8xf32>
      tpu.vector_store %arg11[%c0_37, %c0_38], %51 {strides = array<i32>} : memref<8x8xf32, #tpu.memory_space<vmem>>, vector<8x8xf32>,
    } else {
    }
    %c0 = arith.constant 0 : index
    %c0_4 = arith.constant 0 : index
    %c0_5 = arith.constant 0 : index
    %c0_6 = arith.constant 0 : index
    %8 = vector.load %arg4[%c0, %c0_4, %c0_5, %c0_6] : memref<1x1x8x8xf32, #tpu.memory_space<vmem>>, vector<1x1x8x8xf32>
    %9 = vector.shape_cast %8 : vector<1x1x8x8xf32> to vector<8x8xf32>
    %c0_7 = arith.constant 0 : index
    %c0_8 = arith.constant 0 : index
    %c0_9 = arith.constant 0 : index
    %c0_10 = arith.constant 0 : index
    %10 = vector.load %arg5[%c0_7, %c0_8, %c0_9, %c0_10] : memref<1x1x8x8xf32, #tpu.memory_space<vmem>>, vector<1x1x8x8xf32>
    %11 = vector.shape_cast %10 : vector<1x1x8x8xf32> to vector<8x8xf32>
    %cst = arith.constant dense<0.000000e+00> : vector<8x8xf32>
    %12 = tpu.matmul %9, %11, %cst {dimension_numbers = #tpu.dot_dimension_numbers<[1], [1], [0], [0], [0, 0, 1, 0], [], []>} : vector<8x8xf32>, vector<8x8xf32>, vector<8x8xf32> -> vector<8x8xf32>
    %c0_11 = arith.constant 0 : index
    %c0_12 = arith.constant 0 : index
    %13 = vector.load %arg9[%c0_11, %c0_12] : memref<8x128xf32, #tpu.memory_space<vmem>>, vector<8x128xf32>
    %cst_13 = arith.constant dense<0xFF800000> : vector<8xf32>
    %14 = vector.multi_reduction <maximumf>, %12, %cst_13 [1] : vector<8x8xf32> to vector<8xf32>
    %15 = vector.shape_cast %14 : vector<8xf32> to vector<8x1xf32>
    %16 = vector.broadcast %15 : vector<8x1xf32> to vector<8x128xf32>
    %17 = arith.maximumf %13, %16 : vector<8x128xf32>
    %18 = arith.subf %13, %17 : vector<8x128xf32>
    %19 = math.exp2 %18 : vector<8x128xf32>
    %20 = vector.extract_strided_slice %17 {offsets = [0, 0], sizes = [8, 1], strides = [1, 1]} : vector<8x128xf32> to vector<8x1xf32>
    %21 = vector.broadcast %20 : vector<8x1xf32> to vector<8x8xf32>
    %22 = arith.subf %12, %21 : vector<8x8xf32>
    %23 = math.exp2 %22 : vector<8x8xf32>
    %c0_14 = arith.constant 0 : index
    %c0_15 = arith.constant 0 : index
    %24 = vector.load %arg10[%c0_14, %c0_15] : memref<8x128xf32, #tpu.memory_space<vmem>>, vector<8x128xf32>
    %25 = arith.mulf %19, %24 : vector<8x128xf32>
    %cst_16 = arith.constant dense<0.000000e+00> : vector<8xf32>
    %26 = vector.multi_reduction <add>, %23, %cst_16 [1] : vector<8x8xf32> to vector<8xf32>
    %27 = vector.shape_cast %26 : vector<8xf32> to vector<8x1xf32>
    %28 = vector.broadcast %27 : vector<8x1xf32> to vector<8x128xf32>
    %29 = arith.addf %25, %28 : vector<8x128xf32>
    %c0_17 = arith.constant 0 : index
    %c0_18 = arith.constant 0 : index
    %30 = vector.load %arg10[%c0_17, %c0_18] : memref<8x128xf32, #tpu.memory_space<vmem>>, vector<8x128xf32>
    tpu.vector_store %arg10[%c0_17, %c0_18], %29 {strides = array<i32>} : memref<8x128xf32, #tpu.memory_space<vmem>>, vector<8x128xf32>,
    %31 = vector.extract_strided_slice %19 {offsets = [0, 0], sizes = [8, 1], strides = [1, 1]} : vector<8x128xf32> to vector<8x1xf32>
    %c0_19 = arith.constant 0 : index
    %c0_20 = arith.constant 0 : index
    %32 = vector.load %arg11[%c0_19, %c0_20] : memref<8x8xf32, #tpu.memory_space<vmem>>, vector<8x8xf32>
    %33 = vector.broadcast %31 : vector<8x1xf32> to vector<8x8xf32>
    %34 = arith.mulf %33, %32 : vector<8x8xf32>
    %cst_21 = arith.constant dense<0.000000e+00> : vector<8x8xf32>
    %35 = tpu.matmul %23, %11, %cst_21 {dimension_numbers = #tpu.dot_dimension_numbers<[1], [0], [0], [1], [0, 0, 1, 1], [], []>} : vector<8x8xf32>, vector<8x8xf32>, vector<8x8xf32> -> vector<8x8xf32>
    %36 = arith.addf %34, %35 : vector<8x8xf32>
    %c0_22 = arith.constant 0 : index
    %c0_23 = arith.constant 0 : index
    %37 = vector.load %arg11[%c0_22, %c0_23] : memref<8x8xf32, #tpu.memory_space<vmem>>, vector<8x8xf32>
    tpu.vector_store %arg11[%c0_22, %c0_23], %36 {strides = array<i32>} : memref<8x8xf32, #tpu.memory_space<vmem>>, vector<8x8xf32>,
    %c0_24 = arith.constant 0 : index
    %c0_25 = arith.constant 0 : index
    %38 = vector.load %arg9[%c0_24, %c0_25] : memref<8x128xf32, #tpu.memory_space<vmem>>, vector<8x128xf32>
    tpu.vector_store %arg9[%c0_24, %c0_25], %17 {strides = array<i32>} : memref<8x128xf32, #tpu.memory_space<vmem>>, vector<8x128xf32>,
    %c0_i32_26 = arith.constant 0 : i32
    %39 = arith.cmpi eq, %arg3, %c0_i32_26 : i32
    %40 = arith.extui %39 : i1 to i32
    %c0_i32_27 = arith.constant 0 : i32
    %41 = arith.cmpi ne, %40, %c0_i32_27 : i32
    scf.if %41 {
      %c0_30 = arith.constant 0 : index
      %c0_31 = arith.constant 0 : index
      %47 = vector.load %arg10[%c0_30, %c0_31] : memref<8x128xf32, #tpu.memory_space<vmem>>, vector<8x128xf32>
      %48 = vector.extract_strided_slice %47 {offsets = [0, 0], sizes = [8, 1], strides = [1, 1]} : vector<8x128xf32> to vector<8x1xf32>
      %49 = tpu.reciprocal %48 {approx = true} : vector<8x1xf32> -> vector<8x1xf32>
      %c0_32 = arith.constant 0 : index
      %c0_33 = arith.constant 0 : index
      %50 = vector.load %arg11[%c0_32, %c0_33] : memref<8x8xf32, #tpu.memory_space<vmem>>, vector<8x8xf32>
      %51 = vector.broadcast %49 : vector<8x1xf32> to vector<8x8xf32>
      %52 = arith.mulf %50, %51 : vector<8x8xf32>
      %c0_34 = arith.constant 0 : index
      %c0_35 = arith.constant 0 : index
      %53 = vector.load %arg12[%c0_34, %c0_35] : memref<8x32xf32, #tpu.memory_space<vmem>>, vector<8x32xf32>
      %c0_36 = arith.constant 0 : index
      %c0_37 = arith.constant 0 : index
      %54 = vector.load %arg6[%c0_36, %c0_37] : memref<8x32xf32, #tpu.memory_space<vmem>>, vector<8x32xf32>
      %cst_38 = arith.constant dense<0.000000e+00> : vector<8x32xf32>
      %55 = tpu.matmul %52, %54, %cst_38 {dimension_numbers = #tpu.dot_dimension_numbers<[1], [0], [0], [1], [0, 0, 1, 1], [], []>} : vector<8x8xf32>, vector<8x32xf32>, vector<8x32xf32> -> vector<8x32xf32>
      %56 = arith.addf %53, %55 : vector<8x32xf32>
      %c0_39 = arith.constant 0 : index
      %c0_40 = arith.constant 0 : index
      %57 = vector.load %arg12[%c0_39, %c0_40] : memref<8x32xf32, #tpu.memory_space<vmem>>, vector<8x32xf32>
      tpu.vector_store %arg12[%c0_39, %c0_40], %56 {strides = array<i32>} : memref<8x32xf32, #tpu.memory_space<vmem>>, vector<8x32xf32>,
    } else {
    }
    %c3_i32 = arith.constant 3 : i32
    %42 = arith.cmpi eq, %arg2, %c3_i32 : i32
    %c0_i32_28 = arith.constant 0 : i32
    %43 = arith.cmpi eq, %arg3, %c0_i32_28 : i32
    %44 = arith.andi %42, %43 : i1
    %45 = arith.extui %44 : i1 to i32
    %c0_i32_29 = arith.constant 0 : i32
    %46 = arith.cmpi ne, %45, %c0_i32_29 : i32
    scf.if %46 {
      %c0_30 = arith.constant 0 : index
      %c0_31 = arith.constant 0 : index
      %47 = vector.load %arg12[%c0_30, %c0_31] : memref<8x32xf32, #tpu.memory_space<vmem>>, vector<8x32xf32>
      %c0_32 = arith.constant 0 : index
      %c0_33 = arith.constant 0 : index
      %48 = vector.load %arg7[%c0_32, %c0_33] : memref<1x32xf32, #tpu.memory_space<vmem>>, vector<1x32xf32>
      %49 = vector.broadcast %48 : vector<1x32xf32> to vector<8x32xf32>
      %50 = arith.addf %47, %49 : vector<8x32xf32>
      %c0_34 = arith.constant 0 : index
      %c0_35 = arith.constant 0 : index
      %c0_36 = arith.constant 0 : index
      %51 = vector.load %arg8[%c0_34, %c0_35, %c0_36] : memref<1x8x32xf32, #tpu.memory_space<vmem>>, vector<1x8x32xf32>
      %52 = vector.shape_cast %51 : vector<1x8x32xf32> to vector<8x32xf32>
      %53 = vector.shape_cast %50 : vector<8x32xf32> to vector<1x8x32xf32>
      tpu.vector_store %arg8[%c0_34, %c0_35, %c0_36], %53 {strides = array<i32>} : memref<1x8x32xf32, #tpu.memory_space<vmem>>, vector<1x8x32xf32>,
    } else {
    }
    return
  }
  func.func @transform_0(%arg0: i32, %arg1: i32, %arg2: i32, %arg3: i32) -> (i32, i32, i32, i32) {
    %c0_i32 = arith.constant 0 : i32
    %c0_i32_0 = arith.constant 0 : i32
    return %arg0, %arg2, %arg1, %c0_i32 : i32, i32, i32, i32
  }
  func.func @transform_1(%arg0: i32, %arg1: i32, %arg2: i32, %arg3: i32) -> (i32, i32, i32, i32) {
    %c0_i32 = arith.constant 0 : i32
    %c0_i32_0 = arith.constant 0 : i32
    return %arg0, %arg2, %arg3, %c0_i32 : i32, i32, i32, i32
  }
  func.func @transform_2(%arg0: i32, %arg1: i32, %arg2: i32, %arg3: i32) -> (i32, i32) {
    %c0_i32 = arith.constant 0 : i32
    %c0_i32_0 = arith.constant 0 : i32
    return %arg2, %c0_i32 : i32, i32
  }
  func.func @transform_3(%arg0: i32, %arg1: i32, %arg2: i32, %arg3: i32) -> (i32, i32) {
    %c0_i32 = arith.constant 0 : i32
    %c0_i32_0 = arith.constant 0 : i32
    %c0_i32_1 = arith.constant 0 : i32
    return %c0_i32, %c0_i32_0 : i32, i32
  }
  func.func @transform_4(%arg0: i32, %arg1: i32, %arg2: i32, %arg3: i32) -> (i32, i32, i32) {
    %c0_i32 = arith.constant 0 : i32
    %c0_i32_0 = arith.constant 0 : i32
    return %arg0, %arg1, %c0_i32 : i32, i32, i32
  }
}

</mosaic_0001>

<bundles_post_ra>
// kernel: tile.19
= control target key start
LH: loop header
LB: loop body
LE: loop exit
PB: predicated region body
PF: predicated region fallthrough
CT: control target
= control target key end

     0   :  { %vm43_vm0 = vcmask 1047556   ;;  %vm45_vm1 = vcmask 64512   ;;  %s94_s22 = smov 8   ;;  %s95_s25 = smov 16   ;;  %vm55_vm2 = vcmask 261312   ;;  %vm65_vm3 = vcmask 195712   ;;  %s147_s0 = inlined_call_operand.vmem [shape: f32[8,4,8], index: 0, kind: input, shape index: {}]   ;;  %s148_s1 = inlined_call_operand.vmem [shape: f32[8,32], index: 1, kind: output, shape index: {}]  }
   0x1   :  { %v83_v0 = vld [vmem:[%s147_s0 + $0x1c] sm:$0xf]  ;;  %v84_v1 = vld [vmem:[%s147_s0 + $0x18] sm:$0xf]  ;;  %v85_v2 = vld [vmem:[%s147_s0 + $0x14] sm:$0xf] }
   0x2   :  { %9 = vst [vmem:[#allocation0 + $0x38] sm:$0xf] %v83_v0  ;;  %14 = vst [vmem:[#allocation0 + $0x30] sm:$0xf] %v84_v1  ;;  %v86_v3 = vld [vmem:[%s147_s0 + $0x10] sm:$0xf] }
   0x3   :  { %19 = vst [vmem:[#allocation0 + $0x28] sm:$0xf] %v85_v2  ;;  %v87_v4 = vld [vmem:[%s147_s0 + $0xc] sm:$0xf]  ;;  %v88_v5 = vld [vmem:[%s147_s0 + $0x8] sm:$0xf] }
   0x4   :  { %24 = vst [vmem:[#allocation0 + $0x20] sm:$0xf] %v86_v3  ;;  %29 = vst [vmem:[#allocation0 + $0x18] sm:$0xf] %v87_v4  ;;  %v89_v6 = vld [vmem:[%s147_s0 + $0x4] sm:$0xf] }
   0x5   :  { %34 = vst [vmem:[#allocation0 + $0x10] sm:$0xf] %v88_v5  ;;  %v39_v7 = vld [vmem:[%s147_s0] sm:$0xf]  ;;  %38 = vst [vmem:[#allocation0 + $0x8] sm:$0xf] %v89_v6 }
   0x6   :  { %40 = vst [vmem:[#allocation0] sm:$0xf] %v39_v7  ;;  %s93_s0 = smov 24   ;;  %vm75_vm4 = vcmask 130112  }
   0xb   :  { %v50_v8 = vld [vmem:[#allocation0 + $0x3] ss:$8 sm:$0xf0]   ;;  %v60_v9 = vld [vmem:[#allocation0 + $0x2] ss:$8 sm:$0xf0]  }
   0xc   :  { %v70_v14 = vld [vmem:[#allocation0 + $0x1] ss:$8 sm:$0xf0]   ;;  %v42_v17 = vld [vmem:[#allocation0] ss:$8 sm:$0xf0]  }
   0xd   :  { %v48_v10 = vld [vmem:[#allocation0 + $0x3] ss:$8 sm:$0xf]   ;;  %v58_v11 = vld [vmem:[#allocation0 + $0x2] ss:$8 sm:$0xf]  }
   0xe   :  { %v52_v12 = vsel %vm43_vm0, %v50_v8, %v48_v10  ;;  %v68_v13 = vld [vmem:[#allocation0 + $0x1] ss:$8 sm:$0xf]   ;;  %v41_v16 = vld [vmem:[#allocation0] ss:$8 sm:$0xf]   ;;  %v62_v18 = vsel %vm43_vm0, %v60_v9, %v58_v11 }
   0xf   :  { %53 = vrot.lane.b32.xlu0 %v52_v12, %s93_s0  ;;  %v72_v15 = vsel %vm43_vm0, %v70_v14, %v68_v13  ;;  %v44_v19 = vsel %vm43_vm0, %v42_v17, %v41_v16 }
  0x10   :  { %73 = vrot.lane.b32.xlu1 %v72_v15, %s94_s22  ;;  %46 = vst.msk [vmem:[%s148_s1] sm:$0xff] %vm45_vm1, %v44_v19  }
  0x13   :  { %63 = vrot.lane.b32.xlu0 %v62_v18, %s95_s25 }
  0x81   :  { %v54_v20 = vpop.permute.xlu0 %53  }
  0x82   :  { %56 = vst.msk [vmem:[%s148_s1] sm:$0xff] %vm55_vm2, %v54_v20   ;;  %v74_v21 = vpop.permute.xlu1 %73  }
  0x85   :  { %v64_v22 = vpop.permute.xlu0 %63  }
  0x86   :  { %66 = vst.msk [vmem:[%s148_s1] sm:$0xff] %vm65_vm3, %v64_v22  }
  0x87   :  { %76 = vst.msk [vmem:[%s148_s1] sm:$0xff] %vm75_vm4, %v74_v21  }

// kernel: mh_attention_forward.2
= control target key start
LH: loop header
LB: loop body
LE: loop exit
PB: predicated region body
PF: predicated region fallthrough
CT: control target
= control target key end

     0   :  { %s749_s18 = smov 0   ;;  %s751_s19 = smov 0   ;;  %s815_s0 = inlined_call_operand.vmem [shape: f32[2,8,32], index: 0, kind: input, shape index: {}]   ;;  %s816_s1 = inlined_call_operand.vmem [shape: f32[32,128], index: 1, kind: input, shape index: {}]   ;;  %s817_s2 = inlined_call_operand.vmem [shape: f32[8,32], index: 2, kind: input, shape index: {}]   ;;  %s818_s3 = inlined_call_operand.vmem [shape: f32[8,32], index: 3, kind: input, shape index: {}]   ;;  %s819_s4 = inlined_call_operand.vmem [shape: f32[2,4,8,8], index: 4, kind: output, shape index: {0}]   ;;  %s820_s5 = inlined_call_operand.vmem [shape: f32[2,4,8,8], index: 5, kind: output, shape index: {1}]  }
   0x1   :  { %s753_s20 = smov 0  }
   0x2 LB: > { %s28_s21 = sadd.s32 1, %s702_s19  ;;  %p616_p0 = scmp.ge.s32.totalorder %s706_s20, 1  ;;  %s706_s20 = sphi %s753_s20, %s16_s20   ;;  %s702_s19 = sphi %s751_s19, %s822_s19   ;;  %s698_s18 = sphi %s749_s18, %s821_s18  }
   0x3   : > { %p30_p1 = scmp.ge.s32.totalorder %s28_s21, 2  ;;  %p228_p2 = scmp.lt.s32.totalorder %s706_s20, 3 }
   0x5   : > { %s824_s21 = smov (%p30_p1, %s28_s21), 0  ;;  %p229_p3 = pnand %p616_p0, %p228_p2 }
   0x6   : > { %p277_p4 = scmp.lt.s32.totalorder (!%p229_p3), %s698_s18, 1  ;;  %s710_s30 = smov (!%p229_p3), 64  }
   0x7   : > { %232 = sbr.rel (%p229_p3) target bundleno = 461 (0x1cd), region = 36  ;;  %s711_s9 = smov (!%p229_p3), 32  }
   0x8   : > { %s712_s15 = smov (!%p229_p3), 96   ;;  %s713_s24 = smov (!%p229_p3), 120  }
   0x9   : > { %s714_s25 = smov (!%p229_p3), 88   ;;  %s715_s26 = smov (!%p229_p3), 112  }
   0xa   : > { %s717_s27 = smov (!%p229_p3), 104   ;;  %s718_s28 = smov (!%p229_p3), 72  }
   0xc   : > { %v312_v0 = vld [vmem:[%s816_s1 + $0x18] sm:$0xff]  ;;  %v708_v1 = vmov 0.0   ;;  %v311_v2 = vld [vmem:[%s816_s1 + $0x10] sm:$0xff]  ;;  %vm709_vm0 = vmmov 0   ;;  %v388_v3 = vld [vmem:[%s818_s3] sm:$0xff]  ;;  %s826_s18 = smov (!%p277_p4, %s698_s18), 1 }
   0xd   : > { %638 = vmatprep.subr.mxu0 %v708_v1  ;;  %646 = vmatprep.mubr.msk.f32.mxu0 %vm709_vm0, %v708_v1  ;;  %v387_v4 = vld [vmem:[%s817_s2] sm:$0xff]  ;;  %v310_v5 = vld [vmem:[%s816_s1 + $0x8] sm:$0xff]  ;;  %s617_s8 = sshll.u32 %s826_s18, 3  ;;  %vm313_vm1 = vcmask 261120   ;;  %s631_s16 = sshll.u32 %s826_s18, 5  ;;  %vm414_vm2 = vcmask 64512  }
   0xe   : > { %639 = vmatpush3.msra.mxu0 %v312_v0  ;;  %391 = vrot.lane.b32.xlu0 %v388_v3, %s710_s30  ;;  %v309_v6 = vld [vmem:[%s816_s1] sm:$0xff]  ;;  %s283_s14 = scalar_lea.vmem %s815_s0, %s617_s8  ;;  %s299_s23 = scalar_lea.vmem %s819_s4, %s631_s16 }
   0xf   : > { %640 = vmatprep.subr.mxu0 %v708_v1  ;;  %401 = vrot.lane.b32.xlu1 %v387_v4, %s711_s9  ;;  %v308_v7 = vld [vmem:[%s283_s14] sm:$0xff]  ;;  %s716_s18 = smov 80   ;;  %s307_s6 = scalar_lea.vmem %s820_s5, %s631_s16 }
  0x10   : > { %641 = vmatpush3.msra.mxu0 %v311_v2 }
  0x11   : > { %642 = vmatprep.subr.mxu0 %v708_v1 }
  0x12   : > { %643 = vmatpush3.msra.mxu0 %v310_v5  ;;  %405 = vrot.lane.b32.xlu0 %v388_v3, %s712_s15 }
  0x13   : > { %644 = vmatprep.subr.mxu0 %v708_v1 }
  0x14   : > { %645 = vmatpush3.msra.mxu0 %v309_v6 }
  0x15   : > { %647 = vmatmul.mubr.msk.f32.vlgmr.msra.gmra.mxu0 %vm313_vm1, %v308_v7 }
  0x80   : > { %v392_v8 = vpop.permute.xlu0 %391 }
  0x81   : > { %v402_v14 = vpop.permute.xlu1 %401 }
  0x84   : > { %v406_v9 = vpop.permute.xlu0 %405 }
  0xd5   : > { %v383_v10 = vpop.f32.mrf.mxu0 }
  0xd6   : > { %v408_v11 = vmul.f32 %v406_v9, %v383_v10  ;;  %v394_v12 = vmul.f32 %v392_v8, %v383_v10  ;;  %v404_v15 = vmul.f32 %v402_v14, %v383_v10  ;;  %v389_v16 = vmul.f32 %v387_v4, %v383_v10 }
  0xd7   : > { %v648_v13 = vpop.f32.mrf.mxu0 }
  0xd8   : > { %410 = vrot.lane.b32.xlu0 %v408_v11, %s710_s30  ;;  %396 = vrot.lane.b32.xlu1 %v394_v12, %s710_s30 }
 0x14a   : > { %v411_v17 = vpop.permute.xlu0 %410  ;;  %v397_v18 = vpop.permute.xlu1 %396 }
 0x14b   : > { %v413_v19 = vadd.f32 %v411_v17, %v404_v15  ;;  %v399_v20 = vadd.f32 %v397_v18, %v389_v16 }
 0x14d   : > { %417 = vrot.lane.b32.xlu1 %v413_v19, %s712_s15  ;;  %422 = vrot.lane.b32.xlu0 %v399_v20, %s713_s24  ;;  %415 = vst.msk [vmem:[%s299_s23] sm:$0xff] %vm414_vm2, %v399_v20 }
 0x151   : > { %427 = vrot.lane.b32.xlu1 %v413_v19, %s714_s25  ;;  %432 = vrot.lane.b32.xlu0 %v399_v20, %s715_s26 }
 0x155   : > { %437 = vrot.lane.b32.xlu1 %v413_v19, %s716_s18  ;;  %442 = vrot.lane.b32.xlu0 %v399_v20, %s717_s27 }
 0x159   : > { %447 = vrot.lane.b32.xlu1 %v413_v19, %s718_s28 }
 0x1bf   : > { %v418_v21 = vpop.permute.xlu1 %417  ;;  %v423_v22 = vpop.permute.xlu0 %422 }
 0x1c0   : > { %420 = vst.msk [vmem:[%s307_s6] sm:$0xff] %vm414_vm2, %v418_v21  ;;  %623 = vst.msk [vmem:[%s299_s23 + $0x8] sm:$0xff] %vm414_vm2, %v423_v22 }
 0x1c3   : > { %v428_v23 = vpop.permute.xlu1 %427  ;;  %v433_v24 = vpop.permute.xlu0 %432 }
 0x1c4   : > { %624 = vst.msk [vmem:[%s307_s6 + $0x8] sm:$0xff] %vm414_vm2, %v428_v23  ;;  %625 = vst.msk [vmem:[%s299_s23 + $0x10] sm:$0xff] %vm414_vm2, %v433_v24 }
 0x1c7   : > { %v438_v25 = vpop.permute.xlu1 %437  ;;  %v443_v26 = vpop.permute.xlu0 %442 }
 0x1c8   : > { %626 = vst.msk [vmem:[%s307_s6 + $0x10] sm:$0xff] %vm414_vm2, %v438_v25  ;;  %627 = vst.msk [vmem:[%s299_s23 + $0x18] sm:$0xff] %vm414_vm2, %v443_v26 }
 0x1cb   : > { %v448_v27 = vpop.permute.xlu1 %447 }
 0x1cc   : > { %628 = vst.msk [vmem:[%s307_s6 + $0x18] sm:$0xff] %vm414_vm2, %v448_v27 }
 0x1cd PF: > { %s16_s20 = sadd.s32 1, %s706_s20   ;;  %s821_s18 = smov %s702_s19 }
 0x1ce   : > { %p13_p5 = scmp.ge.s32.totalorder %s16_s20, 4   ;;  %s822_s19 = smov %s824_s21 }
 0x1d0   :  { %15 = sbr.rel (!%p13_p5) target bundleno = 2 (0x2), region = 90 }

// kernel: mh_attention_forward.3
= control target key start
LH: loop header
LB: loop body
LE: loop exit
PB: predicated region body
PF: predicated region fallthrough
CT: control target
= control target key end

     0   :  { %9 = vsyncpa [#allocation7], 0  ;;  %s1152_s0 = inlined_call_operand.vmem [shape: f32[2,4,8,8], index: 0, kind: input, shape index: {}]   ;;  %s1153_s1 = inlined_call_operand.vmem [shape: f32[2,4,8,8], index: 1, kind: input, shape index: {}]   ;;  %s1154_s2 = inlined_call_operand.vmem [shape: f32[32,32], index: 2, kind: input, shape index: {}]   ;;  %s1155_s3 = inlined_call_operand.vmem [shape: f32[1,32], index: 3, kind: input, shape index: {}]   ;;  %s1156_s4 = inlined_call_operand.hbm [shape: f32[2,8,32], index: 4, kind: output, shape index: {}]  }
   0x1   :  { %11 = vsyncpa [#allocation7 + $0x1], 0  ;;  %s995_s15 = smov 0   ;;  %s997_s16 = smov 0  }
   0x2   :  { %s999_s17 = smov 0   ;;  %s1001_s18 = smov 0  }
   0x3   :  { %s1003_s19 = smov 0   ;;  %s1005_s20 = smov 0  }
   0x4   :  { %s1007_s21 = smov 0   ;;  %s1009_s22 = smov 0  }
   0x5 LB: > { %1161 = sst [smem:[#allocation9_spill]] %s955_s20  ;;  %s743_s23 = sadd.s32 4294967295, %s963_s22   ;;  %s963_s22 = sphi %s1009_s22, %s17_s22   ;;  %s959_s21 = sphi %s1007_s21, %s1171_s21   ;;  %s955_s20 = sphi %s1005_s20, %s1170_s20   ;;  %s951_s19 = sphi %s1003_s19, %s1169_s19   ;;  %s947_s18 = sphi %s1001_s18, %s1168_s18   ;;  %s943_s17 = sphi %s999_s17, %s1174_s17   ;;  %s939_s16 = sphi %s997_s16, %s1173_s16   ;;  %s935_s15 = sphi %s995_s15, %s1172_s15  }
   0x6   : > { %1162 = sst [smem:[#allocation10_spill]] %s959_s21  ;;  %s744_s24 = sadd.s32 4294967294, %s963_s22  }
   0x7   : > { %s35_s25 = sadd.s32 1, %s955_s20  ;;  %s43_s26 = sadd.s32 1, %s959_s21 }
   0x8   : > { %p37_p0 = scmp.ge.s32.totalorder %s35_s25, 4  ;;  %p169_p1 = scmp.ne.s32.totalorder %s943_s17, %s939_s16 }
   0x9   : > { %p170_p2 = scmp.eq.s32.totalorder %s743_s23, 7  ;;  %p175_p4 = scmp.ne.s32.totalorder %s939_s16, %s935_s15 }
   0xa   : > { %s1176_s25 = smov (%p37_p0, %s35_s25), 0  ;;  %s1178_s26 = smov (!%p37_p0, %s43_s26), %s959_s21 }
   0xb   : > { %1163 = sst [smem:[#allocation11_spill]] %s1176_s25  ;;  %p1044_p3 = por %p170_p2, %p169_p1 }
   0xc   : > { %p45_p5 = scmp.ge.s32.totalorder %s1178_s26, 2  ;;  %p176_p6 = scmp.eq.s32.totalorder %s744_s24, 7 }
   0xd   : > { %p747_p7 = scmp.ge.s32.totalorder %s963_s22, 1  ;;  %p232_p8 = scmp.lt.s32.totalorder %s963_s22, 9 }
   0xe   : > { %s1180_s26 = smov (%p45_p5, %s1178_s26), 0  ;;  %p1054_p9 = por %p176_p6, %p175_p4 }
   0xf   : > { %1165 = sst [smem:[#allocation12_spill]] %s1180_s26  ;;  %p233_p10 = pnand %p747_p7, %p232_p8 }
  0x10   : > { %s154_s29 = ssub.s32 %s959_s21, %s1180_s26  ;;  %s159_s30 = sadd.s32 1, %s943_s17 }
  0x11   : > { %p157_p11 = scmp.eq.s32.totalorder %s154_s29, 0  ;;  %236 = sbr.rel (%p233_p10) target bundleno = 1017 (0x3f9), region = 36 }
  0x12   : > { %s1158_s6 = sand.u32 (!%p233_p10), 1, %s939_s16   ;;  %p279_p12 = scmp.lt.s32.totalorder (!%p233_p10), %s951_s19, 1 }
  0x13   : > { %s1062_s5 = scalar_select %p157_p11, %s943_s17, %s159_s30  }
  0x14   : > { %s1068_s7 = sshll.u32 (!%p233_p10), %s1158_s6, 3  ;;  %p281_p13 = scmp.lt.s32.totalorder (!%p233_p10), %s947_s18, 3 }
  0x15   : > { %p305_p0 = scmp.eq.s32.totalorder (!%p233_p10), %s947_s18, 0  ;;  %s278_s20 = scalar_lea.vmem (!%p233_p10), [#allocation6], %s1068_s7 }
  0x16   : > { %s280_s8 = scalar_select %p279_p12, %s951_s19, 1  ;;  %vm311_vm0 = vcmask (%p305_p0), 261120   ;;  %v965_v0 = vmov (%p305_p0), 0.0  }
  0x17   : > { %s282_s9 = scalar_select %p281_p13, %s947_s18, 3  ;;  %312 = vst.msk [vmem:[#allocation5] sm:$0xff] (%p305_p0), %vm311_vm0, %v965_v0 }
  0x18   : > { %s749_s10 = sshll.u32 %s280_s8, 2  ;;  %310 = sbr.rel (!%p305_p0) target bundleno = 29 (0x1d), region = 40 }
  0x19   : > { %s287_s11 = sadd.s32 %s749_s10, %s282_s9  ;;  %s753_s12 = sshll.u32 %s282_s9, 3 }
  0x1a   : > { %s750_s13 = sshll.u32 %s287_s11, 3  ;;  %s1077_s24 = scalar_lea.vmem %s1154_s2, %s753_s12 }
  0x1b   : > { %s289_s26 = scalar_lea.vmem %s1152_s0, %s750_s13  ;;  %s300_s21 = scalar_lea.vmem %s1153_s1, %s750_s13 }
  0x1d PF: > { %vm318_vm1 = vcmask 64512   ;;  %v321_v1 = vld [vmem:[%s300_s21] sm:$0xff]  ;;  %v966_v2 = vmov 0.0   ;;  %vm967_vm2 = vmmov 0   ;;  %v968_v4 = vmov 0   ;;  %p593_p1 = scmp.eq.s32.totalorder %s947_s18, 3 }
  0x1e   : > { %773 = vmatprep.subr.mxu0 %v966_v2  ;;  %319 = vst.msk [vmem:[#allocation4] sm:$0xff] %vm318_vm1, %v966_v2  ;;  %775 = vmatprep.mubr.msk.f32.mxu0 %vm967_vm2, %v966_v2  ;;  %v320_v3 = vld [vmem:[%s289_s26] sm:$0xff]  ;;  %v515_v29 = vld [vmem:[#allocation5] sm:$0xff]  ;;  %vm591_vm3 = vcmask 261120  }
  0x1f   : > { %774 = vmatpush3.xpose.msk.msra.mxu0 %vm318_vm1, %v321_v1  ;;  %778 = vmatprep.subr.mxu1 %v966_v2  ;;  %v516_v15 = vld [vmem:[%s1077_s24] sm:$0xff] }
  0x20   : > { %779 = vmatpush3.msra.mxu1 %v321_v1  ;;  %780 = vmatprep.mubr.msk.f32.mxu1 %vm967_vm2, %v966_v2  ;;  %v760_v34 = vld [vmem:[%s1155_s3] ss:$0 sm:$0xff] (%p593_p1) }
  0x21   : > { %783 = vmatprep.subr.mxu1 %v966_v2  ;;  %863 = vset.pattern.permute.xlu0 %v968_v4 }
  0x22   : > { %776 = vmatmul.mubr.msk.f32.vlgmr.msra.gmra.mxu0 %vm318_vm1, %v320_v3  ;;  %864 = vset.pattern.permute.xlu1 %v968_v4 }
  0x25   : > { %v420_v21 = vld [vmem:[#allocation4] sm:$0xff] }
  0xe2   : > { %v395_v5 = vpop.f32.mrf.mxu0 }
  0xe3   : > { %v400_v6 = vsel %vm318_vm1, %v395_v5, -inf }
  0xe4   : > { %401 = vmax.xlane.f32.xlu0 %v400_v6  ;;  %v777_v7 = vpop.f32.mrf.mxu0 }
 0x16d   : > { %v402_v8 = vpop.xlane.xlu0 %401 }
 0x16e   : > { %408 = vperm.xlu0 %863, %v402_v8   ;;  %v404_v12 = vsub.f32 -inf, %v402_v8 }
 0x1e9   : > { %v409_v9 = vpop.permute.xlu0 %408 }
 0x1ea   : > { %v411_v10 = vsub.f32 %v395_v5, %v409_v9 }
 0x1ec   : > { %865 = vpow2.f32 %v411_v10 }
 0x1ed   : > { %867 = vpow2.f32 %v404_v12 }
 0x1f9   : > { %v866_v11 = vpop.eup %865 }
 0x1fa   : > { %781 = vmatmul.mubr.msk.f32.vlgmr.msra.gmra.mxu1 %vm318_vm1, %v866_v11  ;;  %v415_v13 = vsel %vm318_vm1, %v866_v11, 0.0  ;;  %v868_v14 = vpop.eup %867 }
 0x1fb   : > { %416 = vadd.xlane.f32.xlu1 %v415_v13  ;;  %785 = vmatprep.mubr.msk.f32.mxu1 %vm967_vm2, %v966_v2  ;;  %v414_v16 = vmul.f32 0.0, %v868_v14 }
 0x1fc   : > { %784 = vmatpush3.msra.mxu1 %v516_v15 }
 0x20c   : > { %423 = vperm.xlu1 %864, %v868_v14  }
 0x284   : > { %v417_v17 = vpop.xlane.xlu1 %416 }
 0x285   : > { %v418_v18 = vadd.f32 %v417_v17, %v414_v16 }
 0x287   : > { %869 = vrcp.f32 %v418_v18 }
 0x288   : > { %v424_v20 = vpop.permute.xlu1 %423 }
 0x289   : > { %v426_v22 = vmul.f32 %v424_v20, %v420_v21 }
 0x294   : > { %v870_v19 = vpop.eup %869 }
 0x295   : > { %511 = vperm.xlu1 %864, %v870_v19  }
 0x2ba   : > { %v496_v23 = vpop.f32.mrf.mxu1 }
 0x2bb   : > { %v500_v24 = vadd.f32 %v496_v23, %v426_v22 }
 0x2bc   : > { %v782_v25 = vpop.f32.mrf.mxu1 }
 0x2bd   : > { %501 = vst.msk [vmem:[#allocation4] sm:$0xff] %vm318_vm1, %v500_v24 }
 0x2c4   : > { %v508_v27 = vld [vmem:[#allocation4] sm:$0xff] }
 0x310   : > { %v512_v26 = vpop.permute.xlu1 %511 }
 0x311   : > { %v514_v28 = vmul.f32 %v512_v26, %v508_v27 }
 0x313   : > { %786 = vmatmul.mubr.msk.f32.vlgmr.msra.gmra.mxu1 %vm318_vm1, %v514_v28 }
 0x3d2   : > { %597 = sbr.rel (!%p593_p1) target bundleno = 993 (0x3e1), region = 52 }
 0x3d3   : > { %v586_v30 = vpop.f32.mrf.mxu1 }
 0x3d4   : > { %v590_v31 = vadd.f32 %v586_v30, %v515_v29 }
 0x3d5   : > { %v787_v32 = vpop.f32.mrf.mxu1 }
 0x3d6   : > { %592 = vst.msk [vmem:[#allocation5] sm:$0xff] %vm591_vm3, %v590_v31 }
 0x3dd   : > { %v598_v33 = vld [vmem:[#allocation5] sm:$0xff] }
 0x3de   : > { %v606_v35 = vadd.f32 %v760_v34, %v598_v33 }
 0x3e0   : > { %608 = vst.msk [vmem:[%s278_s20] sm:$0xff] %vm591_vm3, %v606_v35 }
 0x3e1 PF: > { %s762_s18 = sshll.u32 %s951_s19, 7  ;;  %s624_s9 = sshll.u32 %s278_s20, 4  ;;  %s625_s9 = int_to_ptr.vmem [resolvable:$true] %s624_s9 }
 0x3e2   : > { %s622_s8 = scalar_lea.hbm %s1156_s4, %s762_s18  ;;  %s1167_s10 = sand.u32 1, %s939_s16  }
 0x3e3   : > { %s610_s11 = scalar_lea.sflag [#allocation7], %s1167_s10  ;;  %s871_s12 = scalar_lea.vmem %s625_s9, 128 }
 0x3e4   : > { %p872_p2 = scmp.ne.s32.totalorder %s625_s9, %s871_s12  ;;  %s969_s13 = smov [#allocation6]  }
 0x3e5   : > { %s875_s14 = sshll.u32 %s969_s13, 4  ;;  %s876_s14 = int_to_ptr.vmem [resolvable:$false] %s875_s14 }
 0x3e6   : > { %p873_p4 = pnand %p872_p2, %p1044_p3  ;;  %s877_s23 = scalar_lea.vmem %s876_s14, 256 }
 0x3e7   : > { %p878_p6 = scmp.lt.s32.totalorder %s625_s9, %s876_s14  ;;  %p879_p7 = scmp.lt.s32.totalorder %s877_s23, %s871_s12 }
 0x3e8   : > { %p874_p5 = pneg %p873_p4 }
 0x3e9   : > { %p880_p8 = por %p879_p7, %p878_p6 }
 0x3eb   : > { %p881_p10 = pnand %p880_p8, %p874_p5 }
 0x3ed   : > { %884 = shalt.err (!%p881_p10)
}
 0x3ee   : > { %s885_s19 = scalar_lea.hbm %s622_s8, 128  ;;  %s889_s24 = scalar_lea.hbm %s1156_s4, 256 }
 0x3ef   : > { %p886_p11 = scmp.ne.s32.totalorder %s622_s8, %s885_s19  ;;  %p890_p0 = scmp.lt.s32.totalorder %s622_s8, %s1156_s4 }
 0x3f0   : > { %p891_p1 = scmp.lt.s32.totalorder %s889_s24, %s885_s19 }
 0x3f1   : > { %p887_p12 = pnand %p886_p11, %p1044_p3 }
 0x3f2   : > { %p892_p2 = por %p891_p1, %p890_p0 }
 0x3f3   : > { %p888_p13 = pneg %p887_p12 }
 0x3f5   : > { %p893_p4 = pnand %p892_p2, %p888_p13 }
 0x3f7   : > { %896 = shalt.err (!%p893_p4)
}
 0x3f8   : > { %788 = dma.vmem_to_hbm [thread:$0]  (%p1044_p3), %s625_s9, 128, %s622_s8, %s610_s11  }
 0x3f9 PF: > { %p794_p5 = scmp.ge.s32.totalorder %s963_s22, 2  ;;  %s636_s21 = sand.u32 1, %s935_s15  }
 0x3fa   : > { %s637_s25 = scalar_lea.sflag [#allocation7], %s636_s21 }
 0x3fb   : > { %p791_p6 = pnand %p794_p5, %p1054_p9 }
 0x3fd   : > { %p792_p7 = pneg %p791_p6 }
 0x3ff   : > { %930 = dma.done.wait (%p792_p7), %s637_s25, 128  }
 0x400   : > { %932 = vsyncadd (%p792_p7), %s637_s25, 4294967168  ;;  %s17_s22 = sadd.s32 1, %s963_s22   ;;  %s1168_s18 = sld [smem:[#allocation9_spill]] }
 0x401   : > { %p14_p8 = scmp.ge.s32.totalorder %s17_s22, 10   ;;  %s1169_s19 = sld [smem:[#allocation10_spill]] }
 0x402   : > { %s1170_s20 = sld [smem:[#allocation11_spill]]  ;;  %s1172_s15 = smov %s939_s16 }
 0x403   : > { %s1171_s21 = sld [smem:[#allocation12_spill]]  ;;  %s1173_s16 = smov %s943_s17 }
 0x404   : > { %s1174_s17 = smov %s1062_s5  ;;  %16 = sbr.rel (!%p14_p8) target bundleno = 5 (0x5), region = 93 }
 0x409   :  { %642 = vsyncpa [#allocation7], 1 }
 0x40a   :  { %644 = vsyncpa [#allocation7 + $0x1], 1 }

</bundles_post_ra>
